<compile_context>
chip_gen: v7x
topology: tpu7x:2x2x1
jax: 0.10.0
libtpu: 0.0.40
codegen_flags: <defaults>
</compile_context>

<pallas_src>
import jax
import jax.numpy as jnp
from jax.experimental import pallas as pl
from jax.experimental.pallas import tpu as pltpu


def _odeg_kernel(x_ref, l_ref, w_ref, o_ref):
    """Grid = (B // Bb,).  Bb batches per grid step.

    x_ref : (Bb, NTp, F)  input slab (cast to f32 here, in VMEM, not in wrapper)
    l_ref : (NTp, NTp)    combined graph + temporal left mix (grid-invariant)
    w_ref : (F, F)        combined feature right mix + identity (grid-invariant)
    o_ref : (Bb, NTp, F)  output slab (lane-dense F, written once per batch)
    """
    x = x_ref[...].astype(jnp.float32)                         # (Bb, NTp, F)
    l = l_ref[...]                                             # (NTp, NTp)
    w = w_ref[...]                                             # (F, F)
    bb, ntp, f = x.shape                                       # static ints

    # Feature mix + (1 - 2*time)*x as ONE big MXU matmul: (Bb*NTp, F) @ (F, F).
    zf = jnp.dot(x.reshape(bb * ntp, f), w,
                 preferred_element_type=jnp.float32).reshape(bb, ntp, f)

    # Graph + temporal mix: (NTp, NTp) @ (NTp, F) per batch in the block.
    for i in range(bb):                                        # static, unrolled
        z = jnp.dot(l, x[i], preferred_element_type=jnp.float32) + zf[i]
        o_ref[i] = jnp.maximum(z, 0.0).astype(o_ref.dtype)     # F.relu


def _pick_block_batches(B, NTp, F, itemsize, vmem_budget_bytes=24 << 20):
    """Largest divisor of B whose x+out blocks (double-buffered) fit the budget,
    capped so that the grid keeps >= 2 steps when B >= 2 (v7x has 2 TCs)."""
    per_batch = 2 * 2 * NTp * F * max(itemsize, 4)
    bb = max(1, min(B, vmem_budget_bytes // per_batch))
    if B >= 2:
        bb = min(bb, max(1, B // 2))
    while B % bb:
        bb -= 1
    return bb


def odeg_forward(x, adj, nodes, params, time):
    """ODEG_ forward: relu(x + time * ODEFunc_(0, x))  (single Euler step)."""
    B, N, T, F = x.shape
    time = float(time)
    NT = N * T
    NTp = ((NT + 127) // 128) * 128          # pad rows to lane-dense multiple of 128

    # ---- parameter preprocessing (tiny, parameter-only; plain JAX) ----
    alpha_sig = jax.nn.sigmoid(params["alpha"][nodes]).astype(jnp.float32)   # (N,)
    d = jnp.clip(params["d"], 0.0, 1.0)
    w_eff = ((params["w"] * d) @ params["w"].T).astype(jnp.float32)          # (F, F)
    d2 = jnp.clip(params["d2"], 0.0, 1.0)
    w2_eff = ((params["w2"] * d2) @ params["w2"].T).astype(jnp.float32)      # (T, T)

    adj_s = (0.5 * time) * alpha_sig[:, None] * adj.astype(jnp.float32)      # (N, N)
    w2_s = time * w2_eff.T                                                   # (T, T)
    eye_t = jnp.eye(T, dtype=jnp.float32)
    eye_n = jnp.eye(N, dtype=jnp.float32)
    l_left = jnp.kron(adj_s, eye_t) + jnp.kron(eye_n, w2_s)                  # (NT, NT)
    if NTp != NT:
        l_left = jnp.pad(l_left, ((0, NTp - NT), (0, NTp - NT)))
    w_right = time * w_eff + (1.0 - 2.0 * time) * jnp.eye(F, dtype=jnp.float32)

    # Contiguous reshape (free); NO dtype cast here (cast happens in VMEM).
    x2d = x.reshape(B, NT, F)
    if NTp != NT:
        x2d = jnp.pad(x2d, ((0, 0), (0, NTp - NT), (0, 0)))

    itemsize = jnp.dtype(x.dtype).itemsize
    Bb = _pick_block_batches(B, NTp, F, itemsize)
    grid = B // Bb

    flops = 2 * B * NTp * NTp * F + 2 * B * NTp * F * F
    bytes_accessed = (B * NTp * F * itemsize            # x in
                      + NTp * NTp * 4 + F * F * 4       # L, W
                      + B * NTp * F * itemsize)         # out
    cost = pl.CostEstimate(flops=int(flops), transcendentals=0,
                           bytes_accessed=int(bytes_accessed))

    def _run(single_buffer_consts):
        # Grid-invariant operands: single-buffer them (pure VMEM saving).
        const_kw = ({"pipeline_mode": pl.Buffered(1)}
                    if single_buffer_consts else {})
        return pl.pallas_call(
            _odeg_kernel,
            out_shape=jax.ShapeDtypeStruct((B, NTp, F), x.dtype),
            grid_spec=pltpu.PrefetchScalarGridSpec(
                num_scalar_prefetch=0,
                grid=(grid,),
                in_specs=[
                    pl.BlockSpec((Bb, NTp, F), lambda b: (b, 0, 0)),        # x slab
                    pl.BlockSpec((NTp, NTp), lambda b: (0, 0), **const_kw),  # L_left
                    pl.BlockSpec((F, F), lambda b: (0, 0), **const_kw),      # W_right
                ],
                out_specs=pl.BlockSpec((Bb, NTp, F), lambda b: (b, 0, 0)),
            ),
            compiler_params=pltpu.CompilerParams(
                dimension_semantics=("parallel",),
                vmem_limit_bytes=48 << 20),
            cost_estimate=cost,
        )(x2d, l_left, w_right)

    try:
        out2d = jax.block_until_ready(_run(True))
    except Exception:
        # Fallback if this jax build rejects pipeline_mode=pl.Buffered(1).
        out2d = _run(False)

    if NTp != NT:
        out2d = out2d[:, :NT, :]
    return out2d.reshape(B, N, T, F)


def odeg_reference(x, adj, nodes, params, time):
    """Pure-JAX reference mirroring the PyTorch module line by line."""
    alpha = jax.nn.sigmoid(params["alpha"][nodes])[None, :, None, None]
    xa = jnp.einsum("ij,kjlm->kilm", adj, x)
    d = jnp.clip(params["d"], 0.0, 1.0)
    w = (params["w"] * d) @ params["w"].T
    xw = jnp.einsum("ijkl,lm->ijkm", x, w)
    d2 = jnp.clip(params["d2"], 0.0, 1.0)
    w2 = (params["w2"] * d2) @ params["w2"].T
    xw2 = jnp.einsum("ijkl,km->ijml", x, w2)
    x0 = x
    f = alpha / 2 * xa - x + xw - x + xw2 - x + x0
    z = x + time * f            # odeint euler, t = [0, time], one step
    return jax.nn.relu(z)


if __name__ == "__main__":
    # ODEG_(feature_dim, temporal_dim, node_num, time) at small sizes.
    feature_dim, temporal_dim, node_num, time = 128, 8, 16, 1.25
    B, N = 2, 8   # batch, number of selected nodes (len(nodes))

    key = jax.random.PRNGKey(0)
    k = jax.random.split(key, 8)

    # Deterministic parameter init (shapes from ODEFunc_.__init__),
    # perturbed so the computation is non-trivial.
    params = {
        "alpha": 0.8 * jnp.ones((node_num,), jnp.float32)
                 + 0.1 * jax.random.normal(k[0], (node_num,), jnp.float32),
        "w": jnp.eye(feature_dim, dtype=jnp.float32)
             + 0.05 * jax.random.normal(k[1], (feature_dim, feature_dim),
                                        jnp.float32),
        "d": jnp.ones((feature_dim,), jnp.float32)
             + 0.3 * jax.random.normal(k[2], (feature_dim,), jnp.float32),
        "w2": jnp.eye(temporal_dim, dtype=jnp.float32)
              + 0.05 * jax.random.normal(k[3], (temporal_dim, temporal_dim),
                                         jnp.float32),
        "d2": jnp.ones((temporal_dim,), jnp.float32)
              + 0.3 * jax.random.normal(k[4], (temporal_dim,), jnp.float32),
    }

    x = jax.random.normal(k[5], (B, N, temporal_dim, feature_dim), jnp.float32)
    adj = 0.3 * jax.random.normal(k[6], (N, N), jnp.float32)
    nodes = jax.random.permutation(k[7], node_num)[:N]

    out = odeg_forward(x, adj, nodes, params, time)
    out = jax.block_until_ready(out)

    ref = odeg_reference(x, adj, nodes, params, time)
    assert out.shape == ref.shape == (B, N, temporal_dim, feature_dim)
    max_err = float(jnp.max(jnp.abs(out - ref)))
    assert max_err < 1e-2, f"max abs error {max_err}"
    print("KERNEL_OK")
</pallas_src>

<mosaic_0001>
module attributes {stable_mosaic.version = 11 : i64} {
  func.func @_odeg_kernel(%arg0: i32, %arg1: memref<1x128x128xf32, #tpu.memory_space<vmem>>, %arg2: memref<128x128xf32, #tpu.memory_space<vmem>>, %arg3: memref<128x128xf32, #tpu.memory_space<vmem>>, %arg4: memref<1x128x128xf32, #tpu.memory_space<vmem>>) attributes {dimension_semantics = [#tpu.dimension_semantics<parallel>], iteration_bounds = array<i64: 2>, scalar_prefetch = 0 : i64, scratch_operands = 0 : i64, tpu.core_type = #tpu.core_type<tc>, window_params = [{transform_indices = @transform_0, window_bounds = array<i64: 1, 128, 128>}, {pipeline_mode = #tpu.pipeline_mode<synchronous>, transform_indices = @transform_1, window_bounds = array<i64: 128, 128>}, {pipeline_mode = #tpu.pipeline_mode<synchronous>, transform_indices = @transform_2, window_bounds = array<i64: 128, 128>}, {transform_indices = @transform_3, window_bounds = array<i64: 1, 128, 128>}]} {
    %c0 = arith.constant 0 : index
    %c0_0 = arith.constant 0 : index
    %c0_1 = arith.constant 0 : index
    %0 = vector.load %arg1[%c0, %c0_0, %c0_1] : memref<1x128x128xf32, #tpu.memory_space<vmem>>, vector<1x128x128xf32>
    %c0_2 = arith.constant 0 : index
    %c0_3 = arith.constant 0 : index
    %1 = vector.load %arg2[%c0_2, %c0_3] : memref<128x128xf32, #tpu.memory_space<vmem>>, vector<128x128xf32>
    %c0_4 = arith.constant 0 : index
    %c0_5 = arith.constant 0 : index
    %2 = vector.load %arg3[%c0_4, %c0_5] : memref<128x128xf32, #tpu.memory_space<vmem>>, vector<128x128xf32>
    %3 = vector.shape_cast %0 : vector<1x128x128xf32> to vector<128x128xf32>
    %cst = arith.constant dense<0.000000e+00> : vector<128x128xf32>
    %4 = tpu.matmul %3, %2, %cst {dimension_numbers = #tpu.dot_dimension_numbers<[1], [0], [0], [1], [0, 0, 1, 1], [], []>} : vector<128x128xf32>, vector<128x128xf32>, vector<128x128xf32> -> vector<128x128xf32>
    %5 = vector.shape_cast %4 : vector<128x128xf32> to vector<1x128x128xf32>
    %6 = vector.shape_cast %0 : vector<1x128x128xf32> to vector<128x128xf32>
    %cst_6 = arith.constant dense<0.000000e+00> : vector<128x128xf32>
    %7 = tpu.matmul %1, %6, %cst_6 {dimension_numbers = #tpu.dot_dimension_numbers<[1], [0], [0], [1], [0, 0, 1, 1], [], []>} : vector<128x128xf32>, vector<128x128xf32>, vector<128x128xf32> -> vector<128x128xf32>
    %8 = vector.shape_cast %5 : vector<1x128x128xf32> to vector<128x128xf32>
    %9 = arith.addf %7, %8 : vector<128x128xf32>
    %cst_7 = arith.constant 0.000000e+00 : f32
    %10 = vector.broadcast %cst_7 : f32 to vector<128x128xf32>
    %11 = arith.maximumf %9, %10 : vector<128x128xf32>
    %c0_8 = arith.constant 0 : index
    %c0_9 = arith.constant 0 : index
    %c0_10 = arith.constant 0 : index
    %12 = vector.load %arg4[%c0_8, %c0_9, %c0_10] : memref<1x128x128xf32, #tpu.memory_space<vmem>>, vector<1x128x128xf32>
    %13 = vector.shape_cast %12 : vector<1x128x128xf32> to vector<128x128xf32>
    %14 = vector.shape_cast %11 : vector<128x128xf32> to vector<1x128x128xf32>
    tpu.vector_store %arg4[%c0_8, %c0_9, %c0_10], %14 {strides = array<i32>} : memref<1x128x128xf32, #tpu.memory_space<vmem>>, vector<1x128x128xf32>,
    return
  }
  func.func @transform_0(%arg0: i32) -> (i32, i32, i32) {
    %c0_i32 = arith.constant 0 : i32
    %c0_i32_0 = arith.constant 0 : i32
    %c0_i32_1 = arith.constant 0 : i32
    return %arg0, %c0_i32, %c0_i32_0 : i32, i32, i32
  }
  func.func @transform_1(%arg0: i32) -> (i32, i32) {
    %c0_i32 = arith.constant 0 : i32
    %c0_i32_0 = arith.constant 0 : i32
    %c0_i32_1 = arith.constant 0 : i32
    return %c0_i32, %c0_i32_0 : i32, i32
  }
  func.func @transform_2(%arg0: i32) -> (i32, i32) {
    %c0_i32 = arith.constant 0 : i32
    %c0_i32_0 = arith.constant 0 : i32
    %c0_i32_1 = arith.constant 0 : i32
    return %c0_i32, %c0_i32_0 : i32, i32
  }
  func.func @transform_3(%arg0: i32) -> (i32, i32, i32) {
    %c0_i32 = arith.constant 0 : i32
    %c0_i32_0 = arith.constant 0 : i32
    %c0_i32_1 = arith.constant 0 : i32
    return %arg0, %c0_i32, %c0_i32_0 : i32, i32, i32
  }
}

module attributes {stable_mosaic.version = 11 : i64} {
  func.func @_odeg_kernel(%arg0: i32, %arg1: memref<1x128x128xf32, #tpu.memory_space<vmem>>, %arg2: memref<128x128xf32, #tpu.memory_space<vmem>>, %arg3: memref<128x128xf32, #tpu.memory_space<vmem>>, %arg4: memref<1x128x128xf32, #tpu.memory_space<vmem>>) attributes {dimension_semantics = [#tpu.dimension_semantics<parallel>], iteration_bounds = array<i64: 2>, scalar_prefetch = 0 : i64, scratch_operands = 0 : i64, tpu.core_type = #tpu.core_type<tc>, window_params = [{transform_indices = @transform_0, window_bounds = array<i64: 1, 128, 128>}, {pipeline_mode = #tpu.pipeline_mode<synchronous>, transform_indices = @transform_1, window_bounds = array<i64: 128, 128>}, {pipeline_mode = #tpu.pipeline_mode<synchronous>, transform_indices = @transform_2, window_bounds = array<i64: 128, 128>}, {transform_indices = @transform_3, window_bounds = array<i64: 1, 128, 128>}]} {
    %c0 = arith.constant 0 : index
    %c0_0 = arith.constant 0 : index
    %c0_1 = arith.constant 0 : index
    %0 = vector.load %arg1[%c0, %c0_0, %c0_1] : memref<1x128x128xf32, #tpu.memory_space<vmem>>, vector<1x128x128xf32>
    %c0_2 = arith.constant 0 : index
    %c0_3 = arith.constant 0 : index
    %1 = vector.load %arg2[%c0_2, %c0_3] : memref<128x128xf32, #tpu.memory_space<vmem>>, vector<128x128xf32>
    %c0_4 = arith.constant 0 : index
    %c0_5 = arith.constant 0 : index
    %2 = vector.load %arg3[%c0_4, %c0_5] : memref<128x128xf32, #tpu.memory_space<vmem>>, vector<128x128xf32>
    %3 = vector.shape_cast %0 : vector<1x128x128xf32> to vector<128x128xf32>
    %cst = arith.constant dense<0.000000e+00> : vector<128x128xf32>
    %4 = tpu.matmul %3, %2, %cst {dimension_numbers = #tpu.dot_dimension_numbers<[1], [0], [0], [1], [0, 0, 1, 1], [], []>} : vector<128x128xf32>, vector<128x128xf32>, vector<128x128xf32> -> vector<128x128xf32>
    %5 = vector.shape_cast %4 : vector<128x128xf32> to vector<1x128x128xf32>
    %6 = vector.shape_cast %0 : vector<1x128x128xf32> to vector<128x128xf32>
    %cst_6 = arith.constant dense<0.000000e+00> : vector<128x128xf32>
    %7 = tpu.matmul %1, %6, %cst_6 {dimension_numbers = #tpu.dot_dimension_numbers<[1], [0], [0], [1], [0, 0, 1, 1], [], []>} : vector<128x128xf32>, vector<128x128xf32>, vector<128x128xf32> -> vector<128x128xf32>
    %8 = vector.shape_cast %5 : vector<1x128x128xf32> to vector<128x128xf32>
    %9 = arith.addf %7, %8 : vector<128x128xf32>
    %cst_7 = arith.constant 0.000000e+00 : f32
    %10 = vector.broadcast %cst_7 : f32 to vector<128x128xf32>
    %11 = arith.maximumf %9, %10 : vector<128x128xf32>
    %c0_8 = arith.constant 0 : index
    %c0_9 = arith.constant 0 : index
    %c0_10 = arith.constant 0 : index
    %12 = vector.load %arg4[%c0_8, %c0_9, %c0_10] : memref<1x128x128xf32, #tpu.memory_space<vmem>>, vector<1x128x128xf32>
    %13 = vector.shape_cast %12 : vector<1x128x128xf32> to vector<128x128xf32>
    %14 = vector.shape_cast %11 : vector<128x128xf32> to vector<1x128x128xf32>
    tpu.vector_store %arg4[%c0_8, %c0_9, %c0_10], %14 {strides = array<i32>} : memref<1x128x128xf32, #tpu.memory_space<vmem>>, vector<1x128x128xf32>,
    return
  }
  func.func @transform_0(%arg0: i32) -> (i32, i32, i32) {
    %c0_i32 = arith.constant 0 : i32
    %c0_i32_0 = arith.constant 0 : i32
    %c0_i32_1 = arith.constant 0 : i32
    return %arg0, %c0_i32, %c0_i32_0 : i32, i32, i32
  }
  func.func @transform_1(%arg0: i32) -> (i32, i32) {
    %c0_i32 = arith.constant 0 : i32
    %c0_i32_0 = arith.constant 0 : i32
    %c0_i32_1 = arith.constant 0 : i32
    return %c0_i32, %c0_i32_0 : i32, i32
  }
  func.func @transform_2(%arg0: i32) -> (i32, i32) {
    %c0_i32 = arith.constant 0 : i32
    %c0_i32_0 = arith.constant 0 : i32
    %c0_i32_1 = arith.constant 0 : i32
    return %c0_i32, %c0_i32_0 : i32, i32
  }
  func.func @transform_3(%arg0: i32) -> (i32, i32, i32) {
    %c0_i32 = arith.constant 0 : i32
    %c0_i32_0 = arith.constant 0 : i32
    %c0_i32_1 = arith.constant 0 : i32
    return %arg0, %c0_i32, %c0_i32_0 : i32, i32, i32
  }
}

</mosaic_0001>

<bundles_post_ra>
// kernel: tpu_custom_call.1
= control target key start
LH: loop header
LB: loop body
LE: loop exit
PB: predicated region body
PF: predicated region fallthrough
CT: control target
= control target key end

     0   :  { %8 = vsyncpa [#allocation3], 0  ;;  %s1551_s0 = inlined_call_operand.hbm [shape: f32[2,128,128], index: 0, kind: input, shape index: {}]   ;;  %s1552_s1 = inlined_call_operand.hbm [shape: f32[128,128], index: 1, kind: input, shape index: {}]   ;;  %s1553_s2 = inlined_call_operand.hbm [shape: f32[128,128], index: 2, kind: input, shape index: {}]   ;;  %s1554_s3 = inlined_call_operand.hbm [shape: f32[2,128,128], index: 3, kind: output, shape index: {}]  }
   0x1   :  { %10 = vsyncpa [#allocation3 + $0x1], 0 }
   0x2   :  { %11 = vsyncpa [#allocation6], 0 }
   0x3   :  { %12 = vsyncpa [#allocation4], 0 }
   0x4   :  { %14 = vsyncpa [#allocation4 + $0x1], 0  ;;  %s1227_s12 = smov 0   ;;  %s1229_s13 = smov 0  }
   0x5   :  { %s1231_s14 = smov 0   ;;  %s1233_s15 = smov 0  }
   0x6 LB: > { %s1248_s16 = sadd.s32 4294967295, %s1197_s15   ;;  %s694_s17 = sadd.s32 4294967294, %s1197_s15   ;;  %s1197_s15 = sphi %s1233_s15, %s1574_s15   ;;  %s1193_s14 = sphi %s1231_s14, %s1573_s14   ;;  %s1189_s13 = sphi %s1229_s13, %s1572_s13   ;;  %s1185_s12 = sphi %s1227_s12, %s1571_s12  }
   0x7   : > { %p40_p0 = scmp.ne.s32.totalorder %s1189_s13, %s1185_s12  ;;  %p1555_p1 = scmp.eq.s32.totalorder %s1248_s16, 0 }
   0x8   : > { %p112_p3 = scmp.eq.s32.totalorder %s694_s17, 1  ;;  %p695_p5 = scmp.ge.s32.totalorder %s1197_s15, 1 }
   0x9   : > { %p1257_p4 = por %p1555_p1, %p40_p0  ;;  %p119_p7 = scmp.lt.s32.totalorder %s1197_s15, 3 }
   0xa   : > { %p1262_p6 = por %p112_p3, %p40_p0  ;;  %s1199_s21 = smov [#allocation5]  }
   0xb   : > { %s1558_s18 = scalar_select %p1257_p4, 1, 0 }
   0xc   : > { %s1559_s19 = scalar_select %p1262_p6, 1, 0 }
   0xd   : > { %p1267_p8 = pnand %p695_p5, %p119_p7  ;;  %s131_s22 = sshll.u32 %s1199_s21, 4  ;;  %s1271_s22 = int_to_ptr.vmem [resolvable:$true] %s131_s22 }
   0xe   : > { %s1200_s24 = smov [#allocation7]   ;;  %s1041_s28 = scalar_lea.hbm %s1552_s1, 2048 }
   0xf   : > { %p982_p9 = pneg %p1267_p8  ;;  %s144_s25 = sshll.u32 %s1200_s24, 4  ;;  %s1282_s25 = int_to_ptr.vmem [resolvable:$true] %s144_s25 }
  0x10   : > { %p1042_p12 = scmp.ne.s32.totalorder %s1552_s1, %s1041_s28  ;;  %p1048_p5 = scmp.lt.u32.totalorder %s1041_s28, %s1552_s1 }
  0x11   : > { %p1278_p11 = pnand %p982_p9, %p1555_p1 }
  0x13   : > { %p1043_p13 = pneg %p1278_p11 }
  0x15   : > { %p1044_p0 = pnand %p1043_p13, %p1042_p12 }
  0x17   : > { %p1045_p3 = pneg %p1044_p0 }
  0x19   : > { %p1050_p7 = pnand %p1048_p5, %p1045_p3 }
  0x1b   : > { %1053 = shalt.err (!%p1050_p7)
}
  0x1c   : > { %s1054_s6 = scalar_lea.vmem %s1271_s22, 2048  ;;  %p1062_p2 = scmp.lt.s32.totalorder %s1271_s22, %s1271_s22 }
  0x1d   : > { %p1055_p9 = scmp.ne.s32.totalorder %s1271_s22, %s1054_s6  ;;  %p1063_p12 = scmp.lt.s32.totalorder %s1054_s6, %s1054_s6 }
  0x1f   : > { %p1057_p10 = pnand %p1055_p9, %p1043_p13  ;;  %p1064_p0 = por %p1063_p12, %p1062_p2 }
  0x21   : > { %p1058_p1 = pneg %p1057_p10 }
  0x23   : > { %p1065_p6 = pnand %p1064_p0, %p1058_p1 }
  0x25   : > { %1068 = shalt.err (!%p1065_p6)
}
  0x26   : > { %s1201_s7 = smov 128   ;;  %s1202_s8 = smov 8  }
  0x27   : > { %985 = dma.hbm_to_vmem [thread:$0]  (!%p1278_p11), %s1552_s1, 2048, %s1271_s22, [#allocation6], %s1201_s7, %s1201_s7, %s1202_s8  }
  0x28   : > { %s1069_s21 = scalar_lea.hbm %s1553_s2, 2048 }
  0x29   : > { %p1070_p1 = scmp.ne.s32.totalorder %s1553_s2, %s1069_s21  ;;  %p1076_p10 = scmp.lt.u32.totalorder %s1069_s21, %s1553_s2 }
  0x2b   : > { %p1072_p2 = pnand %p1070_p1, %p1043_p13 }
  0x2d   : > { %p1073_p6 = pneg %p1072_p2 }
  0x2f   : > { %p1078_p3 = pnand %p1076_p10, %p1073_p6 }
  0x31   : > { %1081 = shalt.err (!%p1078_p3)
}
  0x32   : > { %s1082_s22 = scalar_lea.vmem %s1282_s25, 2048  ;;  %p1090_p12 = scmp.lt.s32.totalorder %s1282_s25, %s1282_s25 }
  0x33   : > { %p1083_p5 = scmp.ne.s32.totalorder %s1282_s25, %s1082_s22  ;;  %p1091_p0 = scmp.lt.s32.totalorder %s1082_s22, %s1082_s22 }
  0x35   : > { %p1085_p7 = pnand %p1083_p5, %p1043_p13  ;;  %p1092_p1 = por %p1091_p0, %p1090_p12 }
  0x37   : > { %p1086_p9 = pneg %p1085_p7 }
  0x39   : > { %p1093_p2 = pnand %p1092_p1, %p1086_p9 }
  0x3b   : > { %1096 = shalt.err (!%p1093_p2)
}
  0x3c   : > { %988 = dma.hbm_to_vmem [thread:$0]  (!%p1278_p11), %s1553_s2, 2048, %s1282_s25, [#allocation6], %s1201_s7, %s1201_s7, %s1202_s8  }
  0x3d   : > { %s1343_s23 = sadd.s32 1, %s1197_s15   ;;  %s27_s4 = sadd.s32 1, %s1193_s14 }
  0x3e   : > { %s24_s5 = ssub.s32 %s1197_s15, %s1343_s23  ;;  %p34_p13 = scmp.ne.s32.totalorder %s1193_s14, %s1189_s13 }
  0x3f   : > { %p25_p6 = scmp.eq.s32.totalorder %s24_s5, 0  ;;  %p35_p10 = scmp.eq.s32.totalorder %s1197_s15, 0 }
  0x40   : > { %p1562_p3 = scmp.eq.s32.totalorder %s1248_s16, 1  ;;  %p999_p7 = scmp.lt.s32.totalorder %s1197_s15, 2 }
  0x41   : > { %s1359_s9 = scalar_select %p25_p6, %s1193_s14, %s27_s4  }
  0x42   : > { %p1353_p5 = por %p1562_p3, %p34_p13  ;;  %p36_p9 = por %p35_p10, %p34_p13 }
  0x43   : > { %s158_s10 = sand.u32 1, %s1193_s14   ;;  %s712_s25 = sshll.u32 %s1197_s15, 11 }
  0x44   : > { %s1563_s6 = scalar_select %p1353_p5, 1, 0 }
  0x45   : > { %s699_s11 = sshll.u32 %s158_s10, 7  ;;  %s1366_s24 = scalar_lea.hbm %s1551_s0, %s712_s25 }
  0x46   : > { %s162_s26 = scalar_lea.vmem [#allocation2], %s699_s11  ;;  %p1370_p11 = pnand %p999_p7, %p36_p9 }
  0x47   : > { %s169_s27 = sshll.u32 %s162_s26, 4  ;;  %s1374_s22 = scalar_lea.sflag [#allocation3], %s158_s10  ;;  %s1368_s27 = int_to_ptr.vmem [resolvable:$true] %s169_s27 }
  0x48   : > { %s1097_s29 = scalar_lea.hbm %s1366_s24, 2048  ;;  %p1099_p0 = pneg %p1370_p11 }
  0x49   : > { %p1098_p12 = scmp.ne.s32.totalorder %s1366_s24, %s1097_s29  ;;  %s1102_s5 = scalar_lea.hbm %s1551_s0, 4096 }
  0x4a   : > { %p1103_p13 = scmp.lt.u32.totalorder %s1366_s24, %s1551_s0  ;;  %p1104_p6 = scmp.lt.u32.totalorder %s1102_s5, %s1097_s29 }
  0x4b   : > { %p1100_p1 = pnand %p1099_p0, %p1098_p12  ;;  %p1106_p3 = scmp.lt.u32.totalorder %s1097_s29, %s1366_s24 }
  0x4c   : > { %p1105_p10 = por %p1104_p6, %p1103_p13 }
  0x4d   : > { %p1101_p2 = pneg %p1100_p1 }
  0x4e   : > { %p1107_p7 = por %p1106_p3, %p1105_p10 }
  0x50   : > { %p1108_p9 = pnand %p1107_p7, %p1101_p2 }
  0x52   : > { %1111 = shalt.err (!%p1108_p9)
}
  0x53   : > { %s1112_s10 = scalar_lea.vmem %s1368_s27, 2048  ;;  %s1203_s17 = smov [#allocation2]  }
  0x54   : > { %p1113_p12 = scmp.ne.s32.totalorder %s1368_s27, %s1112_s10  ;;  %s1117_s21 = sshll.u32 %s1203_s17, 4  ;;  %s1118_s21 = int_to_ptr.vmem [resolvable:$false] %s1117_s21 }
  0x55   : > { %s1119_s26 = scalar_lea.vmem %s1118_s21, 4096  ;;  %p1120_p4 = scmp.lt.s32.totalorder %s1368_s27, %s1118_s21 }
  0x56   : > { %p1115_p1 = pnand %p1113_p12, %p1099_p0  ;;  %p1121_p13 = scmp.lt.s32.totalorder %s1119_s26, %s1112_s10 }
  0x58   : > { %p1116_p5 = pneg %p1115_p1  ;;  %p1122_p6 = por %p1121_p13, %p1120_p4 }
  0x5a   : > { %p1123_p10 = pnand %p1122_p6, %p1116_p5 }
  0x5c   : > { %1126 = shalt.err (!%p1123_p10)
}
  0x5d   : > { %992 = dma.hbm_to_vmem [thread:$0]  (!%p1370_p11), %s1366_s24, 2048, %s1368_s27, %s1374_s22, %s1201_s7, %s1201_s7, %s1202_s8  }
  0x5e   : > { %181 = sbr.rel (%p1267_p8) target bundleno = 401 (0x191), region = 32  ;;  %s1408_s29 = sand.u32 (!%p1267_p8), 1, %s1189_s13  }
  0x5f   : > { %s703_s30 = sshll.u32 (!%p1267_p8), %s1408_s29, 7  ;;  %s184_s4 = scalar_lea.sflag (!%p1267_p8), [#allocation3], %s1408_s29 }
  0x60   : > { %s1414_s28 = scalar_lea.vmem (!%p1267_p8), [#allocation2], %s703_s30  ;;  %p1565_p4 = scmp.ne.s32.totalorder (!%p1267_p8), %s1558_s18, 0 }
  0x65   : > { %1172 = dma.done.wait (%p1565_p4), %s184_s4, 2048  }
  0x66   : > { %1174 = vsyncadd (%p1565_p4), %s184_s4, 4294965248  ;;  %p1566_p5 = scmp.eq.s32.totalorder %s1248_s16, 0 }
  0x68   : > { %1176 = dma.done.wait (%p1566_p5), [#allocation6], 4096   ;;  %p1567_p8 = pmov %p1566_p5 }
  0x69   : > { %v250_v0 = vld [vmem:[#allocation7] sm:$0xff]  ;;  %v251_v1 = vld [vmem:[#allocation7 + $0x8] sm:$0xff]  ;;  %v252_v5 = vld [vmem:[#allocation7 + $0x10] sm:$0xff]  ;;  %s1482_s18 = scalar_lea.vmem [#allocation8], %s703_s30  ;;  %s713_s20 = sshll.u32 %s1248_s16, 11 }
  0x6a   : > { %1178 = vsyncadd (%p1567_p8), [#allocation6], 4294963200  ;;  %v218_v2 = vld [vmem:[%s1414_s28] sm:$0xff]  ;;  %v890_v3 = vpack.c.bf16 %v251_v1, %v250_v0  ;;  %v1426_v4 = vld [vmem:[%s1414_s28 + $0x8] sm:$0xff]  ;;  %s602_s7 = sshll.u32 %s1482_s18, 4  ;;  %s1503_s27 = scalar_lea.hbm %s1554_s3, %s713_s20  ;;  %s1505_s7 = int_to_ptr.vmem [resolvable:$true] %s602_s7 }
  0x6b   : > { %v253_v6 = vld [vmem:[#allocation7 + $0x18] sm:$0xff]  ;;  %810 = vmatprep.mubr.f32.mxu1 %v218_v2  ;;  %v922_v7 = vpack.c.bf16 %v1426_v4, %v218_v2  ;;  %v1430_v9 = vld [vmem:[%s1414_s28 + $0x10] sm:$0xff]  ;;  %v254_v11 = vld [vmem:[#allocation7 + $0x20] sm:$0xff]  ;;  %s589_s16 = scalar_lea.sflag [#allocation4], %s1408_s29  ;;  %s1127_s22 = scalar_lea.vmem %s1505_s7, 2048 }
  0x6c   : > { %v894_v8 = vpack.c.bf16 %v253_v6, %v252_v5  ;;  %v1433_v10 = vld [vmem:[%s1414_s28 + $0x18] sm:$0xff]  ;;  %891 = vmatprep.subr.bf16.mxu1 %v890_v3  ;;  %v255_v13 = vld [vmem:[#allocation7 + $0x28] sm:$0xff]  ;;  %v1438_v14 = vld [vmem:[%s1414_s28 + $0x20] sm:$0xff]  ;;  %p1128_p11 = scmp.ne.s32.totalorder %s1505_s7, %s1127_s22  ;;  %p1568_p0 = scmp.ne.s32.totalorder %s1563_s6, 0 }
  0x6d   : > { %v926_v12 = vpack.c.bf16 %v1433_v10, %v1430_v9  ;;  %v1441_v15 = vld [vmem:[%s1414_s28 + $0x28] sm:$0xff]  ;;  %923 = vmatprep.subr.bf16.mxu0 %v922_v7  ;;  %893 = vmatpush3.bf16.msra.mxu1 %v890_v3  ;;  %v898_v16 = vpack.c.bf16 %v255_v13, %v254_v11  ;;  %v256_v18 = vld [vmem:[#allocation7 + $0x30] sm:$0xff]  ;;  %v257_v19 = vld [vmem:[#allocation7 + $0x38] sm:$0xff]  ;;  %s1204_s5 = smov [#allocation8]  }
  0x6e   : > { %925 = vmatpush3.bf16.msra.mxu0 %v922_v7  ;;  %895 = vmatprep.subr.bf16.mxu1 %v894_v8  ;;  %v930_v17 = vpack.c.bf16 %v1441_v15, %v1438_v14  ;;  %v1446_v20 = vld [vmem:[%s1414_s28 + $0x30] sm:$0xff]  ;;  %v1449_v21 = vld [vmem:[%s1414_s28 + $0x38] sm:$0xff]  ;;  %v902_v22 = vpack.c.bf16 %v257_v19, %v256_v18  ;;  %v258_v24 = vld [vmem:[#allocation7 + $0x40] sm:$0xff]  ;;  %p1129_p2 = pnand %p1128_p11, %p1568_p0  ;;  %s1131_s11 = sshll.u32 %s1204_s5, 4  ;;  %s1132_s11 = int_to_ptr.vmem [resolvable:$false] %s1131_s11 }
  0x6f   : > { %927 = vmatprep.subr.bf16.mxu0 %v926_v12  ;;  %v934_v23 = vpack.c.bf16 %v1449_v21, %v1446_v20  ;;  %v259_v25 = vld [vmem:[#allocation7 + $0x48] sm:$0xff]  ;;  %v234_v26 = vld [vmem:[#allocation5] sm:$0xff]  ;;  %v260_v31 = vld [vmem:[#allocation7 + $0x50] sm:$0xff]  ;;  %s1133_s25 = scalar_lea.vmem %s1132_s11, 4096  ;;  %p1134_p7 = scmp.lt.s32.totalorder %s1505_s7, %s1132_s11 }
  0x70   : > { %v1454_v27 = vld [vmem:[%s1414_s28 + $0x40] sm:$0xff]  ;;  %v1457_v28 = vld [vmem:[%s1414_s28 + $0x48] sm:$0xff]  ;;  %866 = vmatprep.mubr.f32.mxu0 %v234_v26  ;;  %v906_v29 = vpack.c.bf16 %v259_v25, %v258_v24  ;;  %v261_v32 = vld [vmem:[#allocation7 + $0x58] sm:$0xff]  ;;  %p1130_p3 = pneg %p1129_p2  ;;  %p1135_p9 = scmp.lt.s32.totalorder %s1133_s25, %s1127_s22 }
  0x71   : > { %897 = vmatpush3.bf16.msra.mxu1 %v894_v8  ;;  %v938_v30 = vpack.c.bf16 %v1457_v28, %v1454_v27  ;;  %v228_v33 = vld [vmem:[%s1414_s28 + $0x50] sm:$0xff]  ;;  %v1463_v34 = vld [vmem:[%s1414_s28 + $0x58] sm:$0xff]  ;;  %v910_v35 = vpack.c.bf16 %v261_v32, %v260_v31  ;;  %v262_v37 = vld [vmem:[#allocation7 + $0x60] sm:$0xff] }
  0x72   : > { %929 = vmatpush3.bf16.msra.mxu0 %v926_v12  ;;  %899 = vmatprep.subr.bf16.mxu1 %v898_v16  ;;  %v942_v36 = vpack.c.bf16 %v1463_v34, %v228_v33  ;;  %v263_v38 = vld [vmem:[#allocation7 + $0x68] sm:$0xff]  ;;  %v230_v39 = vld [vmem:[%s1414_s28 + $0x60] sm:$0xff]  ;;  %v264_v43 = vld [vmem:[#allocation7 + $0x70] sm:$0xff]  ;;  %p1136_p12 = por %p1135_p9, %p1134_p7 }
  0x73   : > { %931 = vmatprep.subr.bf16.mxu0 %v930_v17  ;;  %v231_v40 = vld [vmem:[%s1414_s28 + $0x68] sm:$0xff]  ;;  %v914_v41 = vpack.c.bf16 %v263_v38, %v262_v37  ;;  %v265_v44 = vld [vmem:[#allocation7 + $0x78] sm:$0xff]  ;;  %v232_v45 = vld [vmem:[%s1414_s28 + $0x70] sm:$0xff] }
  0x74   : > { %v946_v42 = vpack.c.bf16 %v231_v40, %v230_v39  ;;  %v233_v46 = vld [vmem:[%s1414_s28 + $0x78] sm:$0xff]  ;;  %v918_v47 = vpack.c.bf16 %v265_v44, %v264_v43  ;;  %v235_v49 = vld [vmem:[#allocation5 + $0x8] sm:$0xff]  ;;  %v236_v50 = vld [vmem:[#allocation5 + $0x10] sm:$0xff]  ;;  %p1137_p1 = pnand %p1136_p12, %p1130_p3 }
  0x75   : > { %901 = vmatpush3.bf16.msra.mxu1 %v898_v16  ;;  %v950_v48 = vpack.c.bf16 %v233_v46, %v232_v45  ;;  %v237_v51 = vld [vmem:[#allocation5 + $0x18] sm:$0xff]  ;;  %v238_v52 = vld [vmem:[#allocation5 + $0x20] sm:$0xff]  ;;  %v239_v53 = vld [vmem:[#allocation5 + $0x28] sm:$0xff] }
  0x76   : > { %933 = vmatpush3.bf16.msra.mxu0 %v930_v17  ;;  %903 = vmatprep.subr.bf16.mxu1 %v902_v22  ;;  %v240_v54 = vld [vmem:[#allocation5 + $0x30] sm:$0xff]  ;;  %v241_v55 = vld [vmem:[#allocation5 + $0x38] sm:$0xff]  ;;  %v242_v56 = vld [vmem:[#allocation5 + $0x40] sm:$0xff] }
  0x77   : > { %935 = vmatprep.subr.bf16.mxu0 %v934_v23  ;;  %v243_v57 = vld [vmem:[#allocation5 + $0x48] sm:$0xff]  ;;  %v244_v58 = vld [vmem:[#allocation5 + $0x50] sm:$0xff]  ;;  %v245_v59 = vld [vmem:[#allocation5 + $0x58] sm:$0xff] }
  0x78   : > { %v246_v60 = vld [vmem:[#allocation5 + $0x60] sm:$0xff]  ;;  %v247_v61 = vld [vmem:[#allocation5 + $0x68] sm:$0xff]  ;;  %v248_v62 = vld [vmem:[#allocation5 + $0x70] sm:$0xff] }
  0x79   : > { %905 = vmatpush3.bf16.msra.mxu1 %v902_v22  ;;  %v249_v63 = vld [vmem:[#allocation5 + $0x78] sm:$0xff] }
  0x7a   : > { %937 = vmatpush3.bf16.msra.mxu0 %v934_v23  ;;  %907 = vmatprep.subr.bf16.mxu1 %v906_v29 }
  0x7b   : > { %939 = vmatprep.subr.bf16.mxu0 %v938_v30 }
  0x7d   : > { %909 = vmatpush3.bf16.msra.mxu1 %v906_v29 }
  0x7e   : > { %941 = vmatpush3.bf16.msra.mxu0 %v938_v30  ;;  %911 = vmatprep.subr.bf16.mxu1 %v910_v35 }
  0x7f   : > { %943 = vmatprep.subr.bf16.mxu0 %v942_v36 }
  0x81   : > { %913 = vmatpush3.bf16.msra.mxu1 %v910_v35 }
  0x82   : > { %945 = vmatpush3.bf16.msra.mxu0 %v942_v36  ;;  %915 = vmatprep.subr.bf16.mxu1 %v914_v41 }
  0x83   : > { %947 = vmatprep.subr.bf16.mxu0 %v946_v42 }
  0x85   : > { %917 = vmatpush3.bf16.msra.mxu1 %v914_v41 }
  0x86   : > { %949 = vmatpush3.bf16.msra.mxu0 %v946_v42  ;;  %919 = vmatprep.subr.bf16.mxu1 %v918_v47 }
  0x87   : > { %951 = vmatprep.subr.bf16.mxu0 %v950_v48 }
  0x89   : > { %921 = vmatpush3.bf16.msra.mxu1 %v918_v47 }
  0x8a   : > { %953 = vmatpush3.bf16.msra.mxu0 %v950_v48 }
  0x8c   : > { %811 = vmatmul.mubr.f32.vlgmr.msra.gmra.mrb[0].mxu1 %v1426_v4 }
  0x8d   : > { %867 = vmatmul.mubr.f32.vlgmr.msra.gmra.mrb[0].mxu0 %v235_v49  ;;  %813 = vmatprep.mubr.f32.mxu1 %v1430_v9 }
  0x8e   : > { %869 = vmatprep.mubr.f32.mxu0 %v236_v50 }
  0x90   : > { %814 = vmatmul.mubr.f32.gmra.mrb[2].mxu1 %v1433_v10 }
  0x91   : > { %870 = vmatmul.mubr.f32.gmra.mrb[2].mxu0 %v237_v51  ;;  %816 = vmatprep.mubr.f32.mxu1 %v1438_v14 }
  0x92   : > { %872 = vmatprep.mubr.f32.mxu0 %v238_v52 }
  0x94   : > { %817 = vmatmul.mubr.f32.gmra.mrb[4].mxu1 %v1441_v15 }
  0x95   : > { %873 = vmatmul.mubr.f32.gmra.mrb[4].mxu0 %v239_v53  ;;  %819 = vmatprep.mubr.f32.mxu1 %v1446_v20 }
  0x96   : > { %875 = vmatprep.mubr.f32.mxu0 %v240_v54 }
  0x98   : > { %820 = vmatmul.mubr.f32.gmra.mrb[6].mxu1 %v1449_v21 }
  0x99   : > { %876 = vmatmul.mubr.f32.gmra.mrb[6].mxu0 %v241_v55  ;;  %822 = vmatprep.mubr.f32.mxu1 %v1454_v27 }
  0x9a   : > { %878 = vmatprep.mubr.f32.mxu0 %v242_v56 }
  0x9c   : > { %823 = vmatmul.mubr.f32.gmra.mrb[8].mxu1 %v1457_v28 }
  0x9d   : > { %879 = vmatmul.mubr.f32.gmra.mrb[8].mxu0 %v243_v57  ;;  %825 = vmatprep.mubr.f32.mxu1 %v228_v33 }
  0x9e   : > { %881 = vmatprep.mubr.f32.mxu0 %v244_v58 }
  0xa0   : > { %826 = vmatmul.mubr.f32.gmra.mrb[10].mxu1 %v1463_v34 }
  0xa1   : > { %882 = vmatmul.mubr.f32.gmra.mrb[10].mxu0 %v245_v59  ;;  %828 = vmatprep.mubr.f32.mxu1 %v230_v39 }
  0xa2   : > { %884 = vmatprep.mubr.f32.mxu0 %v246_v60 }
  0xa4   : > { %829 = vmatmul.mubr.f32.gmra.mrb[12].mxu1 %v231_v40 }
  0xa5   : > { %885 = vmatmul.mubr.f32.gmra.mrb[12].mxu0 %v247_v61  ;;  %831 = vmatprep.mubr.f32.mxu1 %v232_v45 }
  0xa6   : > { %887 = vmatprep.mubr.f32.mxu0 %v248_v62 }
  0xa8   : > { %832 = vmatmul.mubr.f32.gmra.mrb[14].mxu1 %v233_v46 }
  0xa9   : > { %888 = vmatmul.mubr.f32.gmra.mrb[14].mxu0 %v249_v63 }
 0x15f   : > { %v812_v0 = vpop.f32.mrb[0].mxu1 }
 0x160   : > { %v868_v1 = vpop.f32.mrb[0].mxu0  ;;  %v332_v2 = vpop.f32.mrb[1].mxu1 }
 0x161   : > { %v483_v3 = vadd.f32 %v868_v1, %v812_v0  ;;  %v477_v4 = vpop.f32.mrb[1].mxu0 }
 0x162   : > { %v478_v5 = vadd.f32 %v477_v4, %v332_v2 }
 0x163   : > { %v557_v6 = vmax.f32 %v483_v3, 0.0  ;;  %v815_v7 = vpop.f32.mrb[2].mxu1 }
 0x164   : > { %v556_v8 = vmax.f32 %v478_v5, 0.0  ;;  %v871_v9 = vpop.f32.mrb[2].mxu0  ;;  %v342_v10 = vpop.f32.mrb[3].mxu1 }
 0x165   : > { %573 = vst [vmem:[%s1482_s18 + $0x8] sm:$0xff] %v557_v6  ;;  %v493_v11 = vadd.f32 %v871_v9, %v815_v7  ;;  %v487_v12 = vpop.f32.mrb[3].mxu0 }
 0x166   : > { %572 = vst [vmem:[%s1482_s18] sm:$0xff] %v556_v8  ;;  %v488_v13 = vadd.f32 %v487_v12, %v342_v10 }
 0x167   : > { %v559_v14 = vmax.f32 %v493_v11, 0.0  ;;  %v818_v15 = vpop.f32.mrb[4].mxu1 }
 0x168   : > { %v558_v16 = vmax.f32 %v488_v13, 0.0  ;;  %v874_v17 = vpop.f32.mrb[4].mxu0  ;;  %v352_v18 = vpop.f32.mrb[5].mxu1 }
 0x169   : > { %575 = vst [vmem:[%s1482_s18 + $0x18] sm:$0xff] %v559_v14  ;;  %v503_v19 = vadd.f32 %v874_v17, %v818_v15  ;;  %v497_v20 = vpop.f32.mrb[5].mxu0 }
 0x16a   : > { %574 = vst [vmem:[%s1482_s18 + $0x10] sm:$0xff] %v558_v16  ;;  %v498_v21 = vadd.f32 %v497_v20, %v352_v18 }
 0x16b   : > { %v561_v22 = vmax.f32 %v503_v19, 0.0  ;;  %v821_v23 = vpop.f32.mrb[6].mxu1 }
 0x16c   : > { %v560_v24 = vmax.f32 %v498_v21, 0.0  ;;  %v877_v25 = vpop.f32.mrb[6].mxu0  ;;  %v362_v26 = vpop.f32.mrb[7].mxu1 }
 0x16d   : > { %577 = vst [vmem:[%s1482_s18 + $0x28] sm:$0xff] %v561_v22  ;;  %v513_v27 = vadd.f32 %v877_v25, %v821_v23  ;;  %v507_v28 = vpop.f32.mrb[7].mxu0 }
 0x16e   : > { %576 = vst [vmem:[%s1482_s18 + $0x20] sm:$0xff] %v560_v24  ;;  %v508_v29 = vadd.f32 %v507_v28, %v362_v26 }
 0x16f   : > { %v563_v30 = vmax.f32 %v513_v27, 0.0  ;;  %v824_v31 = vpop.f32.mrb[8].mxu1 }
 0x170   : > { %v562_v32 = vmax.f32 %v508_v29, 0.0  ;;  %v880_v33 = vpop.f32.mrb[8].mxu0  ;;  %v372_v34 = vpop.f32.mrb[9].mxu1 }
 0x171   : > { %579 = vst [vmem:[%s1482_s18 + $0x38] sm:$0xff] %v563_v30  ;;  %v523_v35 = vadd.f32 %v880_v33, %v824_v31  ;;  %v517_v36 = vpop.f32.mrb[9].mxu0 }
 0x172   : > { %578 = vst [vmem:[%s1482_s18 + $0x30] sm:$0xff] %v562_v32  ;;  %v518_v37 = vadd.f32 %v517_v36, %v372_v34 }
 0x173   : > { %v565_v38 = vmax.f32 %v523_v35, 0.0  ;;  %v827_v39 = vpop.f32.mrb[10].mxu1 }
 0x174   : > { %v564_v40 = vmax.f32 %v518_v37, 0.0  ;;  %v883_v41 = vpop.f32.mrb[10].mxu0  ;;  %v382_v42 = vpop.f32.mrb[11].mxu1 }
 0x175   : > { %581 = vst [vmem:[%s1482_s18 + $0x48] sm:$0xff] %v565_v38  ;;  %v533_v43 = vadd.f32 %v883_v41, %v827_v39  ;;  %v527_v44 = vpop.f32.mrb[11].mxu0 }
 0x176   : > { %580 = vst [vmem:[%s1482_s18 + $0x40] sm:$0xff] %v564_v40  ;;  %v528_v45 = vadd.f32 %v527_v44, %v382_v42 }
 0x177   : > { %v567_v46 = vmax.f32 %v533_v43, 0.0  ;;  %v830_v47 = vpop.f32.mrb[12].mxu1 }
 0x178   : > { %v566_v48 = vmax.f32 %v528_v45, 0.0  ;;  %v886_v49 = vpop.f32.mrb[12].mxu0  ;;  %v392_v50 = vpop.f32.mrb[13].mxu1 }
 0x179   : > { %583 = vst [vmem:[%s1482_s18 + $0x58] sm:$0xff] %v567_v46  ;;  %v543_v51 = vadd.f32 %v886_v49, %v830_v47  ;;  %v537_v52 = vpop.f32.mrb[13].mxu0 }
 0x17a   : > { %582 = vst [vmem:[%s1482_s18 + $0x50] sm:$0xff] %v566_v48  ;;  %v538_v53 = vadd.f32 %v537_v52, %v392_v50 }
 0x17b   : > { %v569_v54 = vmax.f32 %v543_v51, 0.0  ;;  %v833_v55 = vpop.f32.mrb[14].mxu1 }
 0x17c   : > { %v568_v56 = vmax.f32 %v538_v53, 0.0  ;;  %v889_v57 = vpop.f32.mrb[14].mxu0  ;;  %v402_v58 = vpop.f32.mrb[15].mxu1 }
 0x17d   : > { %585 = vst [vmem:[%s1482_s18 + $0x68] sm:$0xff] %v569_v54  ;;  %v553_v59 = vadd.f32 %v889_v57, %v833_v55  ;;  %v547_v60 = vpop.f32.mrb[15].mxu0 }
 0x17e   : > { %584 = vst [vmem:[%s1482_s18 + $0x60] sm:$0xff] %v568_v56  ;;  %v548_v61 = vadd.f32 %v547_v60, %v402_v58 }
 0x17f   : > { %v571_v62 = vmax.f32 %v553_v59, 0.0 }
 0x180   : > { %v570_v63 = vmax.f32 %v548_v61, 0.0 }
 0x181   : > { %587 = vst [vmem:[%s1482_s18 + $0x78] sm:$0xff] %v571_v62 }
 0x182   : > { %586 = vst [vmem:[%s1482_s18 + $0x70] sm:$0xff] %v570_v63 }
 0x183   : > { %1140 = shalt.err (!%p1137_p1)
}
 0x184   : > { %s1141_s10 = scalar_lea.hbm %s1503_s27, 2048  ;;  %s1145_s26 = scalar_lea.hbm %s1554_s3, 4096 }
 0x185   : > { %p1142_p13 = scmp.ne.s32.totalorder %s1503_s27, %s1141_s10  ;;  %p1146_p4 = scmp.lt.u32.totalorder %s1503_s27, %s1554_s3 }
 0x186   : > { %p1147_p5 = scmp.lt.u32.totalorder %s1145_s26, %s1141_s10  ;;  %p1149_p11 = scmp.lt.u32.totalorder %s1141_s10, %s1503_s27 }
 0x187   : > { %p1143_p6 = pnand %p1142_p13, %p1568_p0 }
 0x188   : > { %p1148_p8 = por %p1147_p5, %p1146_p4 }
 0x189   : > { %p1144_p10 = pneg %p1143_p6 }
 0x18a   : > { %p1150_p2 = por %p1149_p11, %p1148_p8 }
 0x18c   : > { %p1151_p3 = pnand %p1150_p2, %p1144_p10 }
 0x18e   : > { %1154 = shalt.err (!%p1151_p3)
}
 0x18f   : > { %s1205_s28 = smov 128   ;;  %s1206_s18 = smov 8  }
 0x190   : > { %980 = dma.vmem_to_hbm [thread:$0]  (%p1568_p0), %s1505_s7, 2048, %s1503_s27, %s589_s16, %s1205_s28, %s1205_s28, %s1206_s18  }
 0x191 PF: > { %s617_s20 = sand.u32 1, %s1185_s12   ;;  %p1569_p7 = scmp.ne.s32.totalorder %s1559_s19, 0 }
 0x192   : > { %p1570_p9 = scmp.ge.s32.totalorder %s1197_s15, 2  ;;  %s618_s8 = scalar_lea.sflag [#allocation4], %s617_s20 }
 0x194   : > { %p994_p12 = pnand %p1570_p9, %p1569_p7 }
 0x196   : > { %1180 = dma.done.wait (!%p994_p12), %s618_s8, 2048  }
 0x197   : > { %1182 = vsyncadd (!%p994_p12), %s618_s8, 4294965248  ;;  %p17_p1 = scmp.ge.s32.totalorder %s1343_s23, 4   ;;  %s1571_s12 = smov %s1189_s13 }
 0x198   : > { %s1572_s13 = smov %s1193_s14  ;;  %s1573_s14 = smov %s1359_s9 }
 0x199   : > { %s1574_s15 = smov %s1343_s23  ;;  %19 = sbr.rel (!%p17_p1) target bundleno = 6 (0x6), region = 85 }
 0x1a0   :  { %623 = vsyncpa [#allocation3], 1 }
 0x1a1   :  { %625 = vsyncpa [#allocation3 + $0x1], 1 }
 0x1a2   :  { %626 = vsyncpa [#allocation6], 1 }
 0x1a3   :  { %627 = vsyncpa [#allocation4], 1 }
 0x1a4   :  { %629 = vsyncpa [#allocation4 + $0x1], 1 }

// kernel: tpu_custom_call.1
= control target key start
LH: loop header
LB: loop body
LE: loop exit
PB: predicated region body
PF: predicated region fallthrough
CT: control target
= control target key end

     0   :  { %8 = vsyncpa [#allocation3], 0  ;;  %s1551_s0 = inlined_call_operand.hbm [shape: f32[2,128,128], index: 0, kind: input, shape index: {}]   ;;  %s1552_s1 = inlined_call_operand.hbm [shape: f32[128,128], index: 1, kind: input, shape index: {}]   ;;  %s1553_s2 = inlined_call_operand.hbm [shape: f32[128,128], index: 2, kind: input, shape index: {}]   ;;  %s1554_s3 = inlined_call_operand.hbm [shape: f32[2,128,128], index: 3, kind: output, shape index: {}]  }
   0x1   :  { %10 = vsyncpa [#allocation3 + $0x1], 0 }
   0x2   :  { %11 = vsyncpa [#allocation6], 0 }
   0x3   :  { %12 = vsyncpa [#allocation4], 0 }
   0x4   :  { %14 = vsyncpa [#allocation4 + $0x1], 0  ;;  %s1227_s12 = smov 0   ;;  %s1229_s13 = smov 0  }
   0x5   :  { %s1231_s14 = smov 0   ;;  %s1233_s15 = smov 0  }
   0x6 LB: > { %s1248_s16 = sadd.s32 4294967295, %s1197_s15   ;;  %s694_s17 = sadd.s32 4294967294, %s1197_s15   ;;  %s1197_s15 = sphi %s1233_s15, %s1574_s15   ;;  %s1193_s14 = sphi %s1231_s14, %s1573_s14   ;;  %s1189_s13 = sphi %s1229_s13, %s1572_s13   ;;  %s1185_s12 = sphi %s1227_s12, %s1571_s12  }
   0x7   : > { %p40_p0 = scmp.ne.s32.totalorder %s1189_s13, %s1185_s12  ;;  %p1555_p1 = scmp.eq.s32.totalorder %s1248_s16, 0 }
   0x8   : > { %p112_p3 = scmp.eq.s32.totalorder %s694_s17, 1  ;;  %p695_p5 = scmp.ge.s32.totalorder %s1197_s15, 1 }
   0x9   : > { %p1257_p4 = por %p1555_p1, %p40_p0  ;;  %p119_p7 = scmp.lt.s32.totalorder %s1197_s15, 3 }
   0xa   : > { %p1262_p6 = por %p112_p3, %p40_p0  ;;  %s1199_s21 = smov [#allocation5]  }
   0xb   : > { %s1558_s18 = scalar_select %p1257_p4, 1, 0 }
   0xc   : > { %s1559_s19 = scalar_select %p1262_p6, 1, 0 }
   0xd   : > { %p1267_p8 = pnand %p695_p5, %p119_p7  ;;  %s131_s22 = sshll.u32 %s1199_s21, 4  ;;  %s1271_s22 = int_to_ptr.vmem [resolvable:$true] %s131_s22 }
   0xe   : > { %s1200_s24 = smov [#allocation7]   ;;  %s1041_s28 = scalar_lea.hbm %s1552_s1, 2048 }
   0xf   : > { %p982_p9 = pneg %p1267_p8  ;;  %s144_s25 = sshll.u32 %s1200_s24, 4  ;;  %s1282_s25 = int_to_ptr.vmem [resolvable:$true] %s144_s25 }
  0x10   : > { %p1042_p12 = scmp.ne.s32.totalorder %s1552_s1, %s1041_s28  ;;  %p1048_p5 = scmp.lt.u32.totalorder %s1041_s28, %s1552_s1 }
  0x11   : > { %p1278_p11 = pnand %p982_p9, %p1555_p1 }
  0x13   : > { %p1043_p13 = pneg %p1278_p11 }
  0x15   : > { %p1044_p0 = pnand %p1043_p13, %p1042_p12 }
  0x17   : > { %p1045_p3 = pneg %p1044_p0 }
  0x19   : > { %p1050_p7 = pnand %p1048_p5, %p1045_p3 }
  0x1b   : > { %1053 = shalt.err (!%p1050_p7)
}
  0x1c   : > { %s1054_s6 = scalar_lea.vmem %s1271_s22, 2048  ;;  %p1062_p2 = scmp.lt.s32.totalorder %s1271_s22, %s1271_s22 }
  0x1d   : > { %p1055_p9 = scmp.ne.s32.totalorder %s1271_s22, %s1054_s6  ;;  %p1063_p12 = scmp.lt.s32.totalorder %s1054_s6, %s1054_s6 }
  0x1f   : > { %p1057_p10 = pnand %p1055_p9, %p1043_p13  ;;  %p1064_p0 = por %p1063_p12, %p1062_p2 }
  0x21   : > { %p1058_p1 = pneg %p1057_p10 }
  0x23   : > { %p1065_p6 = pnand %p1064_p0, %p1058_p1 }
  0x25   : > { %1068 = shalt.err (!%p1065_p6)
}
  0x26   : > { %s1201_s7 = smov 128   ;;  %s1202_s8 = smov 8  }
  0x27   : > { %985 = dma.hbm_to_vmem [thread:$0]  (!%p1278_p11), %s1552_s1, 2048, %s1271_s22, [#allocation6], %s1201_s7, %s1201_s7, %s1202_s8  }
  0x28   : > { %s1069_s21 = scalar_lea.hbm %s1553_s2, 2048 }
  0x29   : > { %p1070_p1 = scmp.ne.s32.totalorder %s1553_s2, %s1069_s21  ;;  %p1076_p10 = scmp.lt.u32.totalorder %s1069_s21, %s1553_s2 }
  0x2b   : > { %p1072_p2 = pnand %p1070_p1, %p1043_p13 }
  0x2d   : > { %p1073_p6 = pneg %p1072_p2 }
  0x2f   : > { %p1078_p3 = pnand %p1076_p10, %p1073_p6 }
  0x31   : > { %1081 = shalt.err (!%p1078_p3)
}
  0x32   : > { %s1082_s22 = scalar_lea.vmem %s1282_s25, 2048  ;;  %p1090_p12 = scmp.lt.s32.totalorder %s1282_s25, %s1282_s25 }
  0x33   : > { %p1083_p5 = scmp.ne.s32.totalorder %s1282_s25, %s1082_s22  ;;  %p1091_p0 = scmp.lt.s32.totalorder %s1082_s22, %s1082_s22 }
  0x35   : > { %p1085_p7 = pnand %p1083_p5, %p1043_p13  ;;  %p1092_p1 = por %p1091_p0, %p1090_p12 }
  0x37   : > { %p1086_p9 = pneg %p1085_p7 }
  0x39   : > { %p1093_p2 = pnand %p1092_p1, %p1086_p9 }
  0x3b   : > { %1096 = shalt.err (!%p1093_p2)
}
  0x3c   : > { %988 = dma.hbm_to_vmem [thread:$0]  (!%p1278_p11), %s1553_s2, 2048, %s1282_s25, [#allocation6], %s1201_s7, %s1201_s7, %s1202_s8  }
  0x3d   : > { %s1343_s23 = sadd.s32 1, %s1197_s15   ;;  %s27_s4 = sadd.s32 1, %s1193_s14 }
  0x3e   : > { %s24_s5 = ssub.s32 %s1197_s15, %s1343_s23  ;;  %p34_p13 = scmp.ne.s32.totalorder %s1193_s14, %s1189_s13 }
  0x3f   : > { %p25_p6 = scmp.eq.s32.totalorder %s24_s5, 0  ;;  %p35_p10 = scmp.eq.s32.totalorder %s1197_s15, 0 }
  0x40   : > { %p1562_p3 = scmp.eq.s32.totalorder %s1248_s16, 1  ;;  %p999_p7 = scmp.lt.s32.totalorder %s1197_s15, 2 }
  0x41   : > { %s1359_s9 = scalar_select %p25_p6, %s1193_s14, %s27_s4  }
  0x42   : > { %p1353_p5 = por %p1562_p3, %p34_p13  ;;  %p36_p9 = por %p35_p10, %p34_p13 }
  0x43   : > { %s158_s10 = sand.u32 1, %s1193_s14   ;;  %s712_s25 = sshll.u32 %s1197_s15, 11 }
  0x44   : > { %s1563_s6 = scalar_select %p1353_p5, 1, 0 }
  0x45   : > { %s699_s11 = sshll.u32 %s158_s10, 7  ;;  %s1366_s24 = scalar_lea.hbm %s1551_s0, %s712_s25 }
  0x46   : > { %s162_s26 = scalar_lea.vmem [#allocation2], %s699_s11  ;;  %p1370_p11 = pnand %p999_p7, %p36_p9 }
  0x47   : > { %s169_s27 = sshll.u32 %s162_s26, 4  ;;  %s1374_s22 = scalar_lea.sflag [#allocation3], %s158_s10  ;;  %s1368_s27 = int_to_ptr.vmem [resolvable:$true] %s169_s27 }
  0x48   : > { %s1097_s29 = scalar_lea.hbm %s1366_s24, 2048  ;;  %p1099_p0 = pneg %p1370_p11 }
  0x49   : > { %p1098_p12 = scmp.ne.s32.totalorder %s1366_s24, %s1097_s29  ;;  %s1102_s5 = scalar_lea.hbm %s1551_s0, 4096 }
  0x4a   : > { %p1103_p13 = scmp.lt.u32.totalorder %s1366_s24, %s1551_s0  ;;  %p1104_p6 = scmp.lt.u32.totalorder %s1102_s5, %s1097_s29 }
  0x4b   : > { %p1100_p1 = pnand %p1099_p0, %p1098_p12  ;;  %p1106_p3 = scmp.lt.u32.totalorder %s1097_s29, %s1366_s24 }
  0x4c   : > { %p1105_p10 = por %p1104_p6, %p1103_p13 }
  0x4d   : > { %p1101_p2 = pneg %p1100_p1 }
  0x4e   : > { %p1107_p7 = por %p1106_p3, %p1105_p10 }
  0x50   : > { %p1108_p9 = pnand %p1107_p7, %p1101_p2 }
  0x52   : > { %1111 = shalt.err (!%p1108_p9)
}
  0x53   : > { %s1112_s10 = scalar_lea.vmem %s1368_s27, 2048  ;;  %s1203_s17 = smov [#allocation2]  }
  0x54   : > { %p1113_p12 = scmp.ne.s32.totalorder %s1368_s27, %s1112_s10  ;;  %s1117_s21 = sshll.u32 %s1203_s17, 4  ;;  %s1118_s21 = int_to_ptr.vmem [resolvable:$false] %s1117_s21 }
  0x55   : > { %s1119_s26 = scalar_lea.vmem %s1118_s21, 4096  ;;  %p1120_p4 = scmp.lt.s32.totalorder %s1368_s27, %s1118_s21 }
  0x56   : > { %p1115_p1 = pnand %p1113_p12, %p1099_p0  ;;  %p1121_p13 = scmp.lt.s32.totalorder %s1119_s26, %s1112_s10 }
  0x58   : > { %p1116_p5 = pneg %p1115_p1  ;;  %p1122_p6 = por %p1121_p13, %p1120_p4 }
  0x5a   : > { %p1123_p10 = pnand %p1122_p6, %p1116_p5 }
  0x5c   : > { %1126 = shalt.err (!%p1123_p10)
}
  0x5d   : > { %992 = dma.hbm_to_vmem [thread:$0]  (!%p1370_p11), %s1366_s24, 2048, %s1368_s27, %s1374_s22, %s1201_s7, %s1201_s7, %s1202_s8  }
  0x5e   : > { %181 = sbr.rel (%p1267_p8) target bundleno = 401 (0x191), region = 32  ;;  %s1408_s29 = sand.u32 (!%p1267_p8), 1, %s1189_s13  }
  0x5f   : > { %s703_s30 = sshll.u32 (!%p1267_p8), %s1408_s29, 7  ;;  %s184_s4 = scalar_lea.sflag (!%p1267_p8), [#allocation3], %s1408_s29 }
  0x60   : > { %s1414_s28 = scalar_lea.vmem (!%p1267_p8), [#allocation2], %s703_s30  ;;  %p1565_p4 = scmp.ne.s32.totalorder (!%p1267_p8), %s1558_s18, 0 }
  0x65   : > { %1172 = dma.done.wait (%p1565_p4), %s184_s4, 2048  }
  0x66   : > { %1174 = vsyncadd (%p1565_p4), %s184_s4, 4294965248  ;;  %p1566_p5 = scmp.eq.s32.totalorder %s1248_s16, 0 }
  0x68   : > { %1176 = dma.done.wait (%p1566_p5), [#allocation6], 4096   ;;  %p1567_p8 = pmov %p1566_p5 }
  0x69   : > { %v250_v0 = vld [vmem:[#allocation7] sm:$0xff]  ;;  %v251_v1 = vld [vmem:[#allocation7 + $0x8] sm:$0xff]  ;;  %v252_v5 = vld [vmem:[#allocation7 + $0x10] sm:$0xff]  ;;  %s1482_s18 = scalar_lea.vmem [#allocation8], %s703_s30  ;;  %s713_s20 = sshll.u32 %s1248_s16, 11 }
  0x6a   : > { %1178 = vsyncadd (%p1567_p8), [#allocation6], 4294963200  ;;  %v218_v2 = vld [vmem:[%s1414_s28] sm:$0xff]  ;;  %v890_v3 = vpack.c.bf16 %v251_v1, %v250_v0  ;;  %v1426_v4 = vld [vmem:[%s1414_s28 + $0x8] sm:$0xff]  ;;  %s602_s7 = sshll.u32 %s1482_s18, 4  ;;  %s1503_s27 = scalar_lea.hbm %s1554_s3, %s713_s20  ;;  %s1505_s7 = int_to_ptr.vmem [resolvable:$true] %s602_s7 }
  0x6b   : > { %v253_v6 = vld [vmem:[#allocation7 + $0x18] sm:$0xff]  ;;  %810 = vmatprep.mubr.f32.mxu1 %v218_v2  ;;  %v922_v7 = vpack.c.bf16 %v1426_v4, %v218_v2  ;;  %v1430_v9 = vld [vmem:[%s1414_s28 + $0x10] sm:$0xff]  ;;  %v254_v11 = vld [vmem:[#allocation7 + $0x20] sm:$0xff]  ;;  %s589_s16 = scalar_lea.sflag [#allocation4], %s1408_s29  ;;  %s1127_s22 = scalar_lea.vmem %s1505_s7, 2048 }
  0x6c   : > { %v894_v8 = vpack.c.bf16 %v253_v6, %v252_v5  ;;  %v1433_v10 = vld [vmem:[%s1414_s28 + $0x18] sm:$0xff]  ;;  %891 = vmatprep.subr.bf16.mxu1 %v890_v3  ;;  %v255_v13 = vld [vmem:[#allocation7 + $0x28] sm:$0xff]  ;;  %v1438_v14 = vld [vmem:[%s1414_s28 + $0x20] sm:$0xff]  ;;  %p1128_p11 = scmp.ne.s32.totalorder %s1505_s7, %s1127_s22  ;;  %p1568_p0 = scmp.ne.s32.totalorder %s1563_s6, 0 }
  0x6d   : > { %v926_v12 = vpack.c.bf16 %v1433_v10, %v1430_v9  ;;  %v1441_v15 = vld [vmem:[%s1414_s28 + $0x28] sm:$0xff]  ;;  %923 = vmatprep.subr.bf16.mxu0 %v922_v7  ;;  %893 = vmatpush3.bf16.msra.mxu1 %v890_v3  ;;  %v898_v16 = vpack.c.bf16 %v255_v13, %v254_v11  ;;  %v256_v18 = vld [vmem:[#allocation7 + $0x30] sm:$0xff]  ;;  %v257_v19 = vld [vmem:[#allocation7 + $0x38] sm:$0xff]  ;;  %s1204_s5 = smov [#allocation8]  }
  0x6e   : > { %925 = vmatpush3.bf16.msra.mxu0 %v922_v7  ;;  %895 = vmatprep.subr.bf16.mxu1 %v894_v8  ;;  %v930_v17 = vpack.c.bf16 %v1441_v15, %v1438_v14  ;;  %v1446_v20 = vld [vmem:[%s1414_s28 + $0x30] sm:$0xff]  ;;  %v1449_v21 = vld [vmem:[%s1414_s28 + $0x38] sm:$0xff]  ;;  %v902_v22 = vpack.c.bf16 %v257_v19, %v256_v18  ;;  %v258_v24 = vld [vmem:[#allocation7 + $0x40] sm:$0xff]  ;;  %p1129_p2 = pnand %p1128_p11, %p1568_p0  ;;  %s1131_s11 = sshll.u32 %s1204_s5, 4  ;;  %s1132_s11 = int_to_ptr.vmem [resolvable:$false] %s1131_s11 }
  0x6f   : > { %927 = vmatprep.subr.bf16.mxu0 %v926_v12  ;;  %v934_v23 = vpack.c.bf16 %v1449_v21, %v1446_v20  ;;  %v259_v25 = vld [vmem:[#allocation7 + $0x48] sm:$0xff]  ;;  %v234_v26 = vld [vmem:[#allocation5] sm:$0xff]  ;;  %v260_v31 = vld [vmem:[#allocation7 + $0x50] sm:$0xff]  ;;  %s1133_s25 = scalar_lea.vmem %s1132_s11, 4096  ;;  %p1134_p7 = scmp.lt.s32.totalorder %s1505_s7, %s1132_s11 }
  0x70   : > { %v1454_v27 = vld [vmem:[%s1414_s28 + $0x40] sm:$0xff]  ;;  %v1457_v28 = vld [vmem:[%s1414_s28 + $0x48] sm:$0xff]  ;;  %866 = vmatprep.mubr.f32.mxu0 %v234_v26  ;;  %v906_v29 = vpack.c.bf16 %v259_v25, %v258_v24  ;;  %v261_v32 = vld [vmem:[#allocation7 + $0x58] sm:$0xff]  ;;  %p1130_p3 = pneg %p1129_p2  ;;  %p1135_p9 = scmp.lt.s32.totalorder %s1133_s25, %s1127_s22 }
  0x71   : > { %897 = vmatpush3.bf16.msra.mxu1 %v894_v8  ;;  %v938_v30 = vpack.c.bf16 %v1457_v28, %v1454_v27  ;;  %v228_v33 = vld [vmem:[%s1414_s28 + $0x50] sm:$0xff]  ;;  %v1463_v34 = vld [vmem:[%s1414_s28 + $0x58] sm:$0xff]  ;;  %v910_v35 = vpack.c.bf16 %v261_v32, %v260_v31  ;;  %v262_v37 = vld [vmem:[#allocation7 + $0x60] sm:$0xff] }
  0x72   : > { %929 = vmatpush3.bf16.msra.mxu0 %v926_v12  ;;  %899 = vmatprep.subr.bf16.mxu1 %v898_v16  ;;  %v942_v36 = vpack.c.bf16 %v1463_v34, %v228_v33  ;;  %v263_v38 = vld [vmem:[#allocation7 + $0x68] sm:$0xff]  ;;  %v230_v39 = vld [vmem:[%s1414_s28 + $0x60] sm:$0xff]  ;;  %v264_v43 = vld [vmem:[#allocation7 + $0x70] sm:$0xff]  ;;  %p1136_p12 = por %p1135_p9, %p1134_p7 }
  0x73   : > { %931 = vmatprep.subr.bf16.mxu0 %v930_v17  ;;  %v231_v40 = vld [vmem:[%s1414_s28 + $0x68] sm:$0xff]  ;;  %v914_v41 = vpack.c.bf16 %v263_v38, %v262_v37  ;;  %v265_v44 = vld [vmem:[#allocation7 + $0x78] sm:$0xff]  ;;  %v232_v45 = vld [vmem:[%s1414_s28 + $0x70] sm:$0xff] }
  0x74   : > { %v946_v42 = vpack.c.bf16 %v231_v40, %v230_v39  ;;  %v233_v46 = vld [vmem:[%s1414_s28 + $0x78] sm:$0xff]  ;;  %v918_v47 = vpack.c.bf16 %v265_v44, %v264_v43  ;;  %v235_v49 = vld [vmem:[#allocation5 + $0x8] sm:$0xff]  ;;  %v236_v50 = vld [vmem:[#allocation5 + $0x10] sm:$0xff]  ;;  %p1137_p1 = pnand %p1136_p12, %p1130_p3 }
  0x75   : > { %901 = vmatpush3.bf16.msra.mxu1 %v898_v16  ;;  %v950_v48 = vpack.c.bf16 %v233_v46, %v232_v45  ;;  %v237_v51 = vld [vmem:[#allocation5 + $0x18] sm:$0xff]  ;;  %v238_v52 = vld [vmem:[#allocation5 + $0x20] sm:$0xff]  ;;  %v239_v53 = vld [vmem:[#allocation5 + $0x28] sm:$0xff] }
  0x76   : > { %933 = vmatpush3.bf16.msra.mxu0 %v930_v17  ;;  %903 = vmatprep.subr.bf16.mxu1 %v902_v22  ;;  %v240_v54 = vld [vmem:[#allocation5 + $0x30] sm:$0xff]  ;;  %v241_v55 = vld [vmem:[#allocation5 + $0x38] sm:$0xff]  ;;  %v242_v56 = vld [vmem:[#allocation5 + $0x40] sm:$0xff] }
  0x77   : > { %935 = vmatprep.subr.bf16.mxu0 %v934_v23  ;;  %v243_v57 = vld [vmem:[#allocation5 + $0x48] sm:$0xff]  ;;  %v244_v58 = vld [vmem:[#allocation5 + $0x50] sm:$0xff]  ;;  %v245_v59 = vld [vmem:[#allocation5 + $0x58] sm:$0xff] }
  0x78   : > { %v246_v60 = vld [vmem:[#allocation5 + $0x60] sm:$0xff]  ;;  %v247_v61 = vld [vmem:[#allocation5 + $0x68] sm:$0xff]  ;;  %v248_v62 = vld [vmem:[#allocation5 + $0x70] sm:$0xff] }
  0x79   : > { %905 = vmatpush3.bf16.msra.mxu1 %v902_v22  ;;  %v249_v63 = vld [vmem:[#allocation5 + $0x78] sm:$0xff] }
  0x7a   : > { %937 = vmatpush3.bf16.msra.mxu0 %v934_v23  ;;  %907 = vmatprep.subr.bf16.mxu1 %v906_v29 }
  0x7b   : > { %939 = vmatprep.subr.bf16.mxu0 %v938_v30 }
  0x7d   : > { %909 = vmatpush3.bf16.msra.mxu1 %v906_v29 }
  0x7e   : > { %941 = vmatpush3.bf16.msra.mxu0 %v938_v30  ;;  %911 = vmatprep.subr.bf16.mxu1 %v910_v35 }
  0x7f   : > { %943 = vmatprep.subr.bf16.mxu0 %v942_v36 }
  0x81   : > { %913 = vmatpush3.bf16.msra.mxu1 %v910_v35 }
  0x82   : > { %945 = vmatpush3.bf16.msra.mxu0 %v942_v36  ;;  %915 = vmatprep.subr.bf16.mxu1 %v914_v41 }
  0x83   : > { %947 = vmatprep.subr.bf16.mxu0 %v946_v42 }
  0x85   : > { %917 = vmatpush3.bf16.msra.mxu1 %v914_v41 }
  0x86   : > { %949 = vmatpush3.bf16.msra.mxu0 %v946_v42  ;;  %919 = vmatprep.subr.bf16.mxu1 %v918_v47 }
  0x87   : > { %951 = vmatprep.subr.bf16.mxu0 %v950_v48 }
  0x89   : > { %921 = vmatpush3.bf16.msra.mxu1 %v918_v47 }
  0x8a   : > { %953 = vmatpush3.bf16.msra.mxu0 %v950_v48 }
  0x8c   : > { %811 = vmatmul.mubr.f32.vlgmr.msra.gmra.mrb[0].mxu1 %v1426_v4 }
  0x8d   : > { %867 = vmatmul.mubr.f32.vlgmr.msra.gmra.mrb[0].mxu0 %v235_v49  ;;  %813 = vmatprep.mubr.f32.mxu1 %v1430_v9 }
  0x8e   : > { %869 = vmatprep.mubr.f32.mxu0 %v236_v50 }
  0x90   : > { %814 = vmatmul.mubr.f32.gmra.mrb[2].mxu1 %v1433_v10 }
  0x91   : > { %870 = vmatmul.mubr.f32.gmra.mrb[2].mxu0 %v237_v51  ;;  %816 = vmatprep.mubr.f32.mxu1 %v1438_v14 }
  0x92   : > { %872 = vmatprep.mubr.f32.mxu0 %v238_v52 }
  0x94   : > { %817 = vmatmul.mubr.f32.gmra.mrb[4].mxu1 %v1441_v15 }
  0x95   : > { %873 = vmatmul.mubr.f32.gmra.mrb[4].mxu0 %v239_v53  ;;  %819 = vmatprep.mubr.f32.mxu1 %v1446_v20 }
  0x96   : > { %875 = vmatprep.mubr.f32.mxu0 %v240_v54 }
  0x98   : > { %820 = vmatmul.mubr.f32.gmra.mrb[6].mxu1 %v1449_v21 }
  0x99   : > { %876 = vmatmul.mubr.f32.gmra.mrb[6].mxu0 %v241_v55  ;;  %822 = vmatprep.mubr.f32.mxu1 %v1454_v27 }
  0x9a   : > { %878 = vmatprep.mubr.f32.mxu0 %v242_v56 }
  0x9c   : > { %823 = vmatmul.mubr.f32.gmra.mrb[8].mxu1 %v1457_v28 }
  0x9d   : > { %879 = vmatmul.mubr.f32.gmra.mrb[8].mxu0 %v243_v57  ;;  %825 = vmatprep.mubr.f32.mxu1 %v228_v33 }
  0x9e   : > { %881 = vmatprep.mubr.f32.mxu0 %v244_v58 }
  0xa0   : > { %826 = vmatmul.mubr.f32.gmra.mrb[10].mxu1 %v1463_v34 }
  0xa1   : > { %882 = vmatmul.mubr.f32.gmra.mrb[10].mxu0 %v245_v59  ;;  %828 = vmatprep.mubr.f32.mxu1 %v230_v39 }
  0xa2   : > { %884 = vmatprep.mubr.f32.mxu0 %v246_v60 }
  0xa4   : > { %829 = vmatmul.mubr.f32.gmra.mrb[12].mxu1 %v231_v40 }
  0xa5   : > { %885 = vmatmul.mubr.f32.gmra.mrb[12].mxu0 %v247_v61  ;;  %831 = vmatprep.mubr.f32.mxu1 %v232_v45 }
  0xa6   : > { %887 = vmatprep.mubr.f32.mxu0 %v248_v62 }
  0xa8   : > { %832 = vmatmul.mubr.f32.gmra.mrb[14].mxu1 %v233_v46 }
  0xa9   : > { %888 = vmatmul.mubr.f32.gmra.mrb[14].mxu0 %v249_v63 }
 0x15f   : > { %v812_v0 = vpop.f32.mrb[0].mxu1 }
 0x160   : > { %v868_v1 = vpop.f32.mrb[0].mxu0  ;;  %v332_v2 = vpop.f32.mrb[1].mxu1 }
 0x161   : > { %v483_v3 = vadd.f32 %v868_v1, %v812_v0  ;;  %v477_v4 = vpop.f32.mrb[1].mxu0 }
 0x162   : > { %v478_v5 = vadd.f32 %v477_v4, %v332_v2 }
 0x163   : > { %v557_v6 = vmax.f32 %v483_v3, 0.0  ;;  %v815_v7 = vpop.f32.mrb[2].mxu1 }
 0x164   : > { %v556_v8 = vmax.f32 %v478_v5, 0.0  ;;  %v871_v9 = vpop.f32.mrb[2].mxu0  ;;  %v342_v10 = vpop.f32.mrb[3].mxu1 }
 0x165   : > { %573 = vst [vmem:[%s1482_s18 + $0x8] sm:$0xff] %v557_v6  ;;  %v493_v11 = vadd.f32 %v871_v9, %v815_v7  ;;  %v487_v12 = vpop.f32.mrb[3].mxu0 }
 0x166   : > { %572 = vst [vmem:[%s1482_s18] sm:$0xff] %v556_v8  ;;  %v488_v13 = vadd.f32 %v487_v12, %v342_v10 }
 0x167   : > { %v559_v14 = vmax.f32 %v493_v11, 0.0  ;;  %v818_v15 = vpop.f32.mrb[4].mxu1 }
 0x168   : > { %v558_v16 = vmax.f32 %v488_v13, 0.0  ;;  %v874_v17 = vpop.f32.mrb[4].mxu0  ;;  %v352_v18 = vpop.f32.mrb[5].mxu1 }
 0x169   : > { %575 = vst [vmem:[%s1482_s18 + $0x18] sm:$0xff] %v559_v14  ;;  %v503_v19 = vadd.f32 %v874_v17, %v818_v15  ;;  %v497_v20 = vpop.f32.mrb[5].mxu0 }
 0x16a   : > { %574 = vst [vmem:[%s1482_s18 + $0x10] sm:$0xff] %v558_v16  ;;  %v498_v21 = vadd.f32 %v497_v20, %v352_v18 }
 0x16b   : > { %v561_v22 = vmax.f32 %v503_v19, 0.0  ;;  %v821_v23 = vpop.f32.mrb[6].mxu1 }
 0x16c   : > { %v560_v24 = vmax.f32 %v498_v21, 0.0  ;;  %v877_v25 = vpop.f32.mrb[6].mxu0  ;;  %v362_v26 = vpop.f32.mrb[7].mxu1 }
 0x16d   : > { %577 = vst [vmem:[%s1482_s18 + $0x28] sm:$0xff] %v561_v22  ;;  %v513_v27 = vadd.f32 %v877_v25, %v821_v23  ;;  %v507_v28 = vpop.f32.mrb[7].mxu0 }
 0x16e   : > { %576 = vst [vmem:[%s1482_s18 + $0x20] sm:$0xff] %v560_v24  ;;  %v508_v29 = vadd.f32 %v507_v28, %v362_v26 }
 0x16f   : > { %v563_v30 = vmax.f32 %v513_v27, 0.0  ;;  %v824_v31 = vpop.f32.mrb[8].mxu1 }
 0x170   : > { %v562_v32 = vmax.f32 %v508_v29, 0.0  ;;  %v880_v33 = vpop.f32.mrb[8].mxu0  ;;  %v372_v34 = vpop.f32.mrb[9].mxu1 }
 0x171   : > { %579 = vst [vmem:[%s1482_s18 + $0x38] sm:$0xff] %v563_v30  ;;  %v523_v35 = vadd.f32 %v880_v33, %v824_v31  ;;  %v517_v36 = vpop.f32.mrb[9].mxu0 }
 0x172   : > { %578 = vst [vmem:[%s1482_s18 + $0x30] sm:$0xff] %v562_v32  ;;  %v518_v37 = vadd.f32 %v517_v36, %v372_v34 }
 0x173   : > { %v565_v38 = vmax.f32 %v523_v35, 0.0  ;;  %v827_v39 = vpop.f32.mrb[10].mxu1 }
 0x174   : > { %v564_v40 = vmax.f32 %v518_v37, 0.0  ;;  %v883_v41 = vpop.f32.mrb[10].mxu0  ;;  %v382_v42 = vpop.f32.mrb[11].mxu1 }
 0x175   : > { %581 = vst [vmem:[%s1482_s18 + $0x48] sm:$0xff] %v565_v38  ;;  %v533_v43 = vadd.f32 %v883_v41, %v827_v39  ;;  %v527_v44 = vpop.f32.mrb[11].mxu0 }
 0x176   : > { %580 = vst [vmem:[%s1482_s18 + $0x40] sm:$0xff] %v564_v40  ;;  %v528_v45 = vadd.f32 %v527_v44, %v382_v42 }
 0x177   : > { %v567_v46 = vmax.f32 %v533_v43, 0.0  ;;  %v830_v47 = vpop.f32.mrb[12].mxu1 }
 0x178   : > { %v566_v48 = vmax.f32 %v528_v45, 0.0  ;;  %v886_v49 = vpop.f32.mrb[12].mxu0  ;;  %v392_v50 = vpop.f32.mrb[13].mxu1 }
 0x179   : > { %583 = vst [vmem:[%s1482_s18 + $0x58] sm:$0xff] %v567_v46  ;;  %v543_v51 = vadd.f32 %v886_v49, %v830_v47  ;;  %v537_v52 = vpop.f32.mrb[13].mxu0 }
 0x17a   : > { %582 = vst [vmem:[%s1482_s18 + $0x50] sm:$0xff] %v566_v48  ;;  %v538_v53 = vadd.f32 %v537_v52, %v392_v50 }
 0x17b   : > { %v569_v54 = vmax.f32 %v543_v51, 0.0  ;;  %v833_v55 = vpop.f32.mrb[14].mxu1 }
 0x17c   : > { %v568_v56 = vmax.f32 %v538_v53, 0.0  ;;  %v889_v57 = vpop.f32.mrb[14].mxu0  ;;  %v402_v58 = vpop.f32.mrb[15].mxu1 }
 0x17d   : > { %585 = vst [vmem:[%s1482_s18 + $0x68] sm:$0xff] %v569_v54  ;;  %v553_v59 = vadd.f32 %v889_v57, %v833_v55  ;;  %v547_v60 = vpop.f32.mrb[15].mxu0 }
 0x17e   : > { %584 = vst [vmem:[%s1482_s18 + $0x60] sm:$0xff] %v568_v56  ;;  %v548_v61 = vadd.f32 %v547_v60, %v402_v58 }
 0x17f   : > { %v571_v62 = vmax.f32 %v553_v59, 0.0 }
 0x180   : > { %v570_v63 = vmax.f32 %v548_v61, 0.0 }
 0x181   : > { %587 = vst [vmem:[%s1482_s18 + $0x78] sm:$0xff] %v571_v62 }
 0x182   : > { %586 = vst [vmem:[%s1482_s18 + $0x70] sm:$0xff] %v570_v63 }
 0x183   : > { %1140 = shalt.err (!%p1137_p1)
}
 0x184   : > { %s1141_s10 = scalar_lea.hbm %s1503_s27, 2048  ;;  %s1145_s26 = scalar_lea.hbm %s1554_s3, 4096 }
 0x185   : > { %p1142_p13 = scmp.ne.s32.totalorder %s1503_s27, %s1141_s10  ;;  %p1146_p4 = scmp.lt.u32.totalorder %s1503_s27, %s1554_s3 }
 0x186   : > { %p1147_p5 = scmp.lt.u32.totalorder %s1145_s26, %s1141_s10  ;;  %p1149_p11 = scmp.lt.u32.totalorder %s1141_s10, %s1503_s27 }
 0x187   : > { %p1143_p6 = pnand %p1142_p13, %p1568_p0 }
 0x188   : > { %p1148_p8 = por %p1147_p5, %p1146_p4 }
 0x189   : > { %p1144_p10 = pneg %p1143_p6 }
 0x18a   : > { %p1150_p2 = por %p1149_p11, %p1148_p8 }
 0x18c   : > { %p1151_p3 = pnand %p1150_p2, %p1144_p10 }
 0x18e   : > { %1154 = shalt.err (!%p1151_p3)
}
 0x18f   : > { %s1205_s28 = smov 128   ;;  %s1206_s18 = smov 8  }
 0x190   : > { %980 = dma.vmem_to_hbm [thread:$0]  (%p1568_p0), %s1505_s7, 2048, %s1503_s27, %s589_s16, %s1205_s28, %s1205_s28, %s1206_s18  }
 0x191 PF: > { %s617_s20 = sand.u32 1, %s1185_s12   ;;  %p1569_p7 = scmp.ne.s32.totalorder %s1559_s19, 0 }
 0x192   : > { %p1570_p9 = scmp.ge.s32.totalorder %s1197_s15, 2  ;;  %s618_s8 = scalar_lea.sflag [#allocation4], %s617_s20 }
 0x194   : > { %p994_p12 = pnand %p1570_p9, %p1569_p7 }
 0x196   : > { %1180 = dma.done.wait (!%p994_p12), %s618_s8, 2048  }
 0x197   : > { %1182 = vsyncadd (!%p994_p12), %s618_s8, 4294965248  ;;  %p17_p1 = scmp.ge.s32.totalorder %s1343_s23, 4   ;;  %s1571_s12 = smov %s1189_s13 }
 0x198   : > { %s1572_s13 = smov %s1193_s14  ;;  %s1573_s14 = smov %s1359_s9 }
 0x199   : > { %s1574_s15 = smov %s1343_s23  ;;  %19 = sbr.rel (!%p17_p1) target bundleno = 6 (0x6), region = 85 }
 0x1a0   :  { %623 = vsyncpa [#allocation3], 1 }
 0x1a1   :  { %625 = vsyncpa [#allocation3 + $0x1], 1 }
 0x1a2   :  { %626 = vsyncpa [#allocation6], 1 }
 0x1a3   :  { %627 = vsyncpa [#allocation4], 1 }
 0x1a4   :  { %629 = vsyncpa [#allocation4 + $0x1], 1 }

</bundles_post_ra>
